<compile_context>
chip_gen: v7x
topology: tpu7x:2x2x1
jax: 0.10.0
libtpu: 0.0.40
codegen_flags: <defaults>
</compile_context>

<pallas_src>
import math
import functools

import jax
import jax.numpy as jnp
from jax import lax
from jax.experimental import pallas as pl
from jax.experimental.pallas import tpu as pltpu


_NEG_FILL = -1000000000.0  # matches the PyTorch module's masked_fill value


def _vmem_capacity_bytes():
    """Physical VMEM per TensorCore; conservative 64 MiB fallback."""
    try:
        return int(pltpu.get_tpu_info().vmem_capacity_bytes)
    except Exception:
        return 64 * 2 ** 20


def _plan_tiling(S, D, in_itemsize, attn_itemsize, mask_bytes, other_bytes):
    """VMEM-aware choice of the query tile TQ and the vmem_limit_bytes."""
    cap = _vmem_capacity_bytes()
    if cap <= 64 * 2 ** 20:                       # v7x-class: 64 MiB per TC
        budget = min(cap - 14 * 2 ** 20, 50 * 2 ** 20)
        tq_cap = 128 if S >= 16384 else 256
    else:                                         # v5e / v6e: 128 MiB per TC
        budget = min(cap - 24 * 2 ** 20, 100 * 2 ** 20)
        tq_cap = 512
    budget = max(budget, 16 * 2 ** 20)

    def step_bytes(tq):
        kv = 2 * 2 * S * D * in_itemsize          # K, V tiles (double-buffered)
        q_ctx = 2 * 2 * tq * D * in_itemsize      # Q in + ctx out
        attn = 2 * tq * S * attn_itemsize         # attn out
        mask = 2 * tq * S * mask_bytes            # bool mask in
        oth = 2 * tq * S * other_bytes            # additive `other` in
        interm = 3 * tq * S * 4                   # live f32 scores/exp/attn
        return kv + q_ctx + attn + mask + oth + interm

    cands = [t for t in (512, 256, 128, 64, 32, 16, 8)
             if t <= min(S, tq_cap) and S % t == 0]
    if in_itemsize < 4 and S > 16:
        cands = [t for t in cands if t >= 16] or cands   # no sub-(16,) bf16 tiles
    if not cands:
        # TODO(synk): pad S to a multiple of 128 (masked padded keys) so attn
        # stores stay lane-dense instead of falling back to a full-S tile.
        cands = [S]

    tq = cands[-1]
    for t in cands:                               # descending: biggest that fits
        if step_bytes(t) <= budget:
            tq = t
            break
    est = step_bytes(tq)
    vmem_limit = int(min(budget, max(32 * 2 ** 20, int(1.25 * est))))
    return tq, vmem_limit


def _sdpa_kernel(*refs, scale, has_mask, has_other):
    it = iter(refs)
    q_ref, k_ref, v_ref = next(it), next(it), next(it)
    mask_ref = next(it) if has_mask else None
    other_ref = next(it) if has_other else None
    ctx_ref, attn_ref = next(it), next(it)

    # Apply 1/sqrt(D) on the (TQ, D) q tile, not on the (TQ, S) f32 scores.
    q = q_ref[...] * jnp.asarray(scale, dtype=q_ref.dtype)
    k = k_ref[...]
    v = v_ref[...]

    # scores = (q*scale) @ K^T; contract D on both operands so the MXU
    # consumes K in its natural (S, D) layout — no XLU transpose.
    scores = lax.dot_general(
        q, k, dimension_numbers=(((1,), (1,)), ((), ())),
        preferred_element_type=jnp.float32)

    if has_other:
        scores = scores + other_ref[...].astype(jnp.float32)
    if has_mask:
        # Exact masked_fill_ semantics (also matches torch on fully-masked rows).
        scores = jnp.where(mask_ref[...], jnp.float32(_NEG_FILL), scores)

    # Numerically stable softmax over the full key axis (exact per q tile).
    m = jnp.max(scores, axis=-1, keepdims=True)
    e = jnp.exp(scores - m)
    denom = jnp.sum(e, axis=-1, keepdims=True)
    # Exact reciprocal: (TQ, 1) vector, negligible cost; approx=True was the
    # v2 correctness failure (bf16 reciprocal on the non-Mosaic path).
    attn_f32 = e * pl.reciprocal(denom)

    # Cast once; reuse for both the attn@V matmul and the attn output store.
    attn_lp = attn_f32.astype(v.dtype)
    ctx = jnp.dot(attn_lp, v, preferred_element_type=jnp.float32)

    ctx_ref[...] = ctx.astype(ctx_ref.dtype)
    if attn_ref.dtype == attn_lp.dtype:
        attn_ref[...] = attn_lp
    else:
        attn_ref[...] = attn_f32.astype(attn_ref.dtype)


def scaled_dot_product_attention(Q, K, V, attn_mask=None, other=None):
    """Pallas equivalent of ScaledDotProductAttention.forward -> (context, attn)."""
    B, H, S, D = Q.shape
    BH = B * H
    scale = 1.0 / math.sqrt(D)

    Qr = Q.reshape(BH, S, D)
    Kr = K.reshape(BH, S, D)
    Vr = V.reshape(BH, S, D)

    has_mask = attn_mask is not None
    has_other = other is not None

    mask_r = None
    if has_mask:
        mask_r = attn_mask.reshape(BH, S, S)
        if mask_r.dtype != jnp.bool_:
            mask_r = mask_r.astype(jnp.bool_)     # 1 byte/elem stream
    other_r = other.reshape(BH, S, S) if has_other else None

    attn_dtype = Q.dtype                          # attn dtype follows the inputs
    in_isz = jnp.dtype(Q.dtype).itemsize
    attn_isz = jnp.dtype(attn_dtype).itemsize
    mask_bytes = 1 if has_mask else 0
    other_bytes = jnp.dtype(other.dtype).itemsize if has_other else 0

    TQ, vmem_limit = _plan_tiling(S, D, in_isz, attn_isz, mask_bytes, other_bytes)
    n_q = S // TQ

    sq = pl.Squeezed()
    q_spec = pl.BlockSpec((sq, TQ, D), lambda bh, qi: (bh, qi, 0))
    kv_spec = pl.BlockSpec((sq, S, D), lambda bh, qi: (bh, 0, 0))   # resident over qi
    ss_spec = pl.BlockSpec((sq, TQ, S), lambda bh, qi: (bh, qi, 0))

    in_specs = [q_spec, kv_spec, kv_spec]
    inputs = [Qr, Kr, Vr]
    if has_mask:
        in_specs.append(ss_spec)
        inputs.append(mask_r)
    if has_other:
        in_specs.append(ss_spec)
        inputs.append(other_r)

    kernel = functools.partial(_sdpa_kernel, scale=scale,
                               has_mask=has_mask, has_other=has_other)

    ctx, attn = pl.pallas_call(
        kernel,
        out_shape=(
            jax.ShapeDtypeStruct((BH, S, D), Q.dtype),
            jax.ShapeDtypeStruct((BH, S, S), attn_dtype),
        ),
        grid_spec=pltpu.PrefetchScalarGridSpec(
            num_scalar_prefetch=0,
            grid=(BH, n_q),
            in_specs=in_specs,
            out_specs=(q_spec, ss_spec),
        ),
        compiler_params=pltpu.CompilerParams(
            # Shard only BH across TensorCores so each core keeps K/V resident
            # across its query tiles (important under v7x's 64 MiB/TC VMEM).
            dimension_semantics=("parallel", "arbitrary"),
            vmem_limit_bytes=vmem_limit),
    )(*inputs)

    return ctx.reshape(B, H, S, D), attn.reshape(B, H, S, S)


def _reference(Q, K, V, attn_mask=None, other=None):
    scores = jnp.matmul(Q, jnp.swapaxes(K, -1, -2)) / math.sqrt(Q.shape[3])
    if other is not None:
        scores = scores + other
    if attn_mask is not None:
        scores = jnp.where(attn_mask, _NEG_FILL, scores)
    attn = jax.nn.softmax(scores, axis=-1)
    context = jnp.matmul(attn, V)
    return context, attn


if __name__ == "__main__":
    key = jax.random.PRNGKey(0)
    kq, kk, kv, ko, km = jax.random.split(key, 5)

    B, H, S, D = 2, 4, 8, 32
    Q = jax.random.normal(kq, (B, H, S, D), dtype=jnp.float32)
    K = jax.random.normal(kk, (B, H, S, D), dtype=jnp.float32)
    V = jax.random.normal(kv, (B, H, S, D), dtype=jnp.float32)
    other = 0.1 * jax.random.normal(ko, (B, H, S, S), dtype=jnp.float32)
    attn_mask = jax.random.bernoulli(km, 0.2, (B, H, S, S))

    # Tolerance covers the gap between Mosaic's f32 matmul path and XLA's
    # default (reduced-precision) matmul used by the pure-JAX reference.
    tol = dict(atol=1e-2, rtol=1e-2)

    # mask + other
    ctx, attn = scaled_dot_product_attention(Q, K, V, attn_mask, other)
    jax.block_until_ready((ctx, attn))
    rc, ra = _reference(Q, K, V, attn_mask, other)
    assert jnp.allclose(ctx, rc, **tol), "ctx mismatch (mask+other)"
    assert jnp.allclose(attn, ra, **tol), "attn mismatch (mask+other)"
    assert jnp.allclose(jnp.sum(attn, axis=-1), 1.0, atol=1e-3), "rows must sum to 1"

    # mask only
    ctx, attn = scaled_dot_product_attention(Q, K, V, attn_mask=attn_mask)
    jax.block_until_ready((ctx, attn))
    rc, ra = _reference(Q, K, V, attn_mask=attn_mask)
    assert jnp.allclose(ctx, rc, **tol), "ctx mismatch (mask)"
    assert jnp.allclose(attn, ra, **tol), "attn mismatch (mask)"

    # no mask / no other — specialised call: no (S,S) mask/other streams at all
    ctx, attn = scaled_dot_product_attention(Q, K, V)
    jax.block_until_ready((ctx, attn))
    rc, ra = _reference(Q, K, V)
    assert jnp.allclose(ctx, rc, **tol), "ctx mismatch (plain)"
    assert jnp.allclose(attn, ra, **tol), "attn mismatch (plain)"

    # multi-tile query axis (n_q > 1) on a longer sequence
    B2, H2, S2, D2 = 1, 2, 1024, 64
    k2a, k2b, k2c = jax.random.split(key, 3)
    Q2 = jax.random.normal(k2a, (B2, H2, S2, D2), dtype=jnp.float32)
    K2 = jax.random.normal(k2b, (B2, H2, S2, D2), dtype=jnp.float32)
    V2 = jax.random.normal(k2c, (B2, H2, S2, D2), dtype=jnp.float32)
    ctx2, attn2 = scaled_dot_product_attention(Q2, K2, V2)
    jax.block_until_ready((ctx2, attn2))
    rc2, ra2 = _reference(Q2, K2, V2)
    assert jnp.allclose(ctx2, rc2, **tol), "ctx mismatch (long seq)"
    assert jnp.allclose(attn2, ra2, **tol), "attn mismatch (long seq)"
    assert jnp.allclose(jnp.sum(attn2, axis=-1), 1.0, atol=1e-3)

    print("KERNEL_OK")
</pallas_src>

<mosaic_0001>
module attributes {stable_mosaic.version = 11 : i64} {
  func.func @_sdpa_kernel(%arg0: i32, %arg1: i32, %arg2: memref<1x8x32xf32, #tpu.memory_space<vmem>>, %arg3: memref<1x8x32xf32, #tpu.memory_space<vmem>>, %arg4: memref<1x8x32xf32, #tpu.memory_space<vmem>>, %arg5: memref<1x8x8xi32, #tpu.memory_space<vmem>>, %arg6: memref<1x8x8xf32, #tpu.memory_space<vmem>>, %arg7: memref<1x8x32xf32, #tpu.memory_space<vmem>>, %arg8: memref<1x8x8xf32, #tpu.memory_space<vmem>>) attributes {dimension_semantics = [#tpu.dimension_semantics<parallel>, #tpu.dimension_semantics<arbitrary>], iteration_bounds = array<i64: 8, 1>, scalar_prefetch = 0 : i64, scratch_operands = 0 : i64, tpu.core_type = #tpu.core_type<tc>, window_params = [{transform_indices = @transform_0, window_bounds = array<i64: 1, 8, 32>}, {transform_indices = @transform_1, window_bounds = array<i64: 1, 8, 32>}, {transform_indices = @transform_2, window_bounds = array<i64: 1, 8, 32>}, {transform_indices = @transform_3, window_bounds = array<i64: 1, 8, 8>}, {transform_indices = @transform_4, window_bounds = array<i64: 1, 8, 8>}, {transform_indices = @transform_5, window_bounds = array<i64: 1, 8, 32>}, {transform_indices = @transform_6, window_bounds = array<i64: 1, 8, 8>}]} {
    %c0 = arith.constant 0 : index
    %c0_0 = arith.constant 0 : index
    %c0_1 = arith.constant 0 : index
    %0 = vector.load %arg2[%c0, %c0_0, %c0_1] : memref<1x8x32xf32, #tpu.memory_space<vmem>>, vector<1x8x32xf32>
    %1 = vector.shape_cast %0 : vector<1x8x32xf32> to vector<8x32xf32>
    %cst = arith.constant 0.176776692 : f32
    %2 = vector.broadcast %cst : f32 to vector<8x32xf32>
    %3 = arith.mulf %1, %2 : vector<8x32xf32>
    %c0_2 = arith.constant 0 : index
    %c0_3 = arith.constant 0 : index
    %c0_4 = arith.constant 0 : index
    %4 = vector.load %arg3[%c0_2, %c0_3, %c0_4] : memref<1x8x32xf32, #tpu.memory_space<vmem>>, vector<1x8x32xf32>
    %5 = vector.shape_cast %4 : vector<1x8x32xf32> to vector<8x32xf32>
    %c0_5 = arith.constant 0 : index
    %c0_6 = arith.constant 0 : index
    %c0_7 = arith.constant 0 : index
    %6 = vector.load %arg4[%c0_5, %c0_6, %c0_7] : memref<1x8x32xf32, #tpu.memory_space<vmem>>, vector<1x8x32xf32>
    %7 = vector.shape_cast %6 : vector<1x8x32xf32> to vector<8x32xf32>
    %cst_8 = arith.constant dense<0.000000e+00> : vector<8x8xf32>
    %8 = tpu.matmul %3, %5, %cst_8 {dimension_numbers = #tpu.dot_dimension_numbers<[1], [1], [0], [0], [0, 0, 1, 0], [], []>} : vector<8x32xf32>, vector<8x32xf32>, vector<8x8xf32> -> vector<8x8xf32>
    %c0_9 = arith.constant 0 : index
    %c0_10 = arith.constant 0 : index
    %c0_11 = arith.constant 0 : index
    %9 = vector.load %arg6[%c0_9, %c0_10, %c0_11] : memref<1x8x8xf32, #tpu.memory_space<vmem>>, vector<1x8x8xf32>
    %10 = vector.shape_cast %9 : vector<1x8x8xf32> to vector<8x8xf32>
    %11 = arith.addf %8, %10 : vector<8x8xf32>
    %c0_12 = arith.constant 0 : index
    %c0_13 = arith.constant 0 : index
    %c0_14 = arith.constant 0 : index
    %12 = vector.load %arg5[%c0_12, %c0_13, %c0_14] : memref<1x8x8xi32, #tpu.memory_space<vmem>>, vector<1x8x8xi32>
    %13 = vector.shape_cast %12 : vector<1x8x8xi32> to vector<8x8xi32>
    %cst_15 = arith.constant dense<0> : vector<8x8xi32>
    %14 = arith.cmpi ne, %13, %cst_15 : vector<8x8xi32>
    %cst_16 = arith.constant -1.000000e+09 : f32
    %15 = vector.broadcast %cst_16 : f32 to vector<8x8xf32>
    %16 = arith.select %14, %15, %11 : vector<8x8xi1>, vector<8x8xf32>
    %cst_17 = arith.constant dense<0xFF800000> : vector<8xf32>
    %17 = vector.multi_reduction <maximumf>, %16, %cst_17 [1] : vector<8x8xf32> to vector<8xf32>
    %18 = vector.shape_cast %17 : vector<8xf32> to vector<8x1xf32>
    %19 = vector.broadcast %18 : vector<8x1xf32> to vector<8x8xf32>
    %20 = arith.subf %16, %19 : vector<8x8xf32>
    %21 = math.exp %20 : vector<8x8xf32>
    %cst_18 = arith.constant dense<0.000000e+00> : vector<8xf32>
    %22 = vector.multi_reduction <add>, %21, %cst_18 [1] : vector<8x8xf32> to vector<8xf32>
    %23 = vector.shape_cast %22 : vector<8xf32> to vector<8x1xf32>
    %24 = tpu.reciprocal %23 : vector<8x1xf32> -> vector<8x1xf32>
    %25 = vector.broadcast %24 : vector<8x1xf32> to vector<8x8xf32>
    %26 = arith.mulf %21, %25 : vector<8x8xf32>
    %cst_19 = arith.constant dense<0.000000e+00> : vector<8x32xf32>
    %27 = tpu.matmul %26, %7, %cst_19 {dimension_numbers = #tpu.dot_dimension_numbers<[1], [0], [0], [1], [0, 0, 1, 1], [], []>} : vector<8x8xf32>, vector<8x32xf32>, vector<8x32xf32> -> vector<8x32xf32>
    %c0_20 = arith.constant 0 : index
    %c0_21 = arith.constant 0 : index
    %c0_22 = arith.constant 0 : index
    %28 = vector.load %arg7[%c0_20, %c0_21, %c0_22] : memref<1x8x32xf32, #tpu.memory_space<vmem>>, vector<1x8x32xf32>
    %29 = vector.shape_cast %28 : vector<1x8x32xf32> to vector<8x32xf32>
    %30 = vector.shape_cast %27 : vector<8x32xf32> to vector<1x8x32xf32>
    tpu.vector_store %arg7[%c0_20, %c0_21, %c0_22], %30 {strides = array<i32>} : memref<1x8x32xf32, #tpu.memory_space<vmem>>, vector<1x8x32xf32>,
    %c0_23 = arith.constant 0 : index
    %c0_24 = arith.constant 0 : index
    %c0_25 = arith.constant 0 : index
    %31 = vector.load %arg8[%c0_23, %c0_24, %c0_25] : memref<1x8x8xf32, #tpu.memory_space<vmem>>, vector<1x8x8xf32>
    %32 = vector.shape_cast %31 : vector<1x8x8xf32> to vector<8x8xf32>
    %33 = vector.shape_cast %26 : vector<8x8xf32> to vector<1x8x8xf32>
    tpu.vector_store %arg8[%c0_23, %c0_24, %c0_25], %33 {strides = array<i32>} : memref<1x8x8xf32, #tpu.memory_space<vmem>>, vector<1x8x8xf32>,
    return
  }
  func.func @transform_0(%arg0: i32, %arg1: i32) -> (i32, i32, i32) {
    %c0_i32 = arith.constant 0 : i32
    %c0_i32_0 = arith.constant 0 : i32
    return %arg0, %arg1, %c0_i32 : i32, i32, i32
  }
  func.func @transform_1(%arg0: i32, %arg1: i32) -> (i32, i32, i32) {
    %c0_i32 = arith.constant 0 : i32
    %c0_i32_0 = arith.constant 0 : i32
    %c0_i32_1 = arith.constant 0 : i32
    return %arg0, %c0_i32, %c0_i32_0 : i32, i32, i32
  }
  func.func @transform_2(%arg0: i32, %arg1: i32) -> (i32, i32, i32) {
    %c0_i32 = arith.constant 0 : i32
    %c0_i32_0 = arith.constant 0 : i32
    %c0_i32_1 = arith.constant 0 : i32
    return %arg0, %c0_i32, %c0_i32_0 : i32, i32, i32
  }
  func.func @transform_3(%arg0: i32, %arg1: i32) -> (i32, i32, i32) {
    %c0_i32 = arith.constant 0 : i32
    %c0_i32_0 = arith.constant 0 : i32
    return %arg0, %arg1, %c0_i32 : i32, i32, i32
  }
  func.func @transform_4(%arg0: i32, %arg1: i32) -> (i32, i32, i32) {
    %c0_i32 = arith.constant 0 : i32
    %c0_i32_0 = arith.constant 0 : i32
    return %arg0, %arg1, %c0_i32 : i32, i32, i32
  }
  func.func @transform_5(%arg0: i32, %arg1: i32) -> (i32, i32, i32) {
    %c0_i32 = arith.constant 0 : i32
    %c0_i32_0 = arith.constant 0 : i32
    return %arg0, %arg1, %c0_i32 : i32, i32, i32
  }
  func.func @transform_6(%arg0: i32, %arg1: i32) -> (i32, i32, i32) {
    %c0_i32 = arith.constant 0 : i32
    %c0_i32_0 = arith.constant 0 : i32
    return %arg0, %arg1, %c0_i32 : i32, i32, i32
  }
}

</mosaic_0001>

<bundles_post_ra>
// kernel: tpu_custom_call.1
= control target key start
LH: loop header
LB: loop body
LE: loop exit
PB: predicated region body
PF: predicated region fallthrough
CT: control target
= control target key end

     0   :  { %s1499_s0 = inlined_call_operand.vmem [shape: f32[8,8,32], index: 0, kind: input, shape index: {}]   ;;  %s1500_s1 = inlined_call_operand.hbm [shape: f32[8,8,32], index: 1, kind: input, shape index: {}]   ;;  %s1501_s2 = inlined_call_operand.hbm [shape: f32[8,8,32], index: 2, kind: input, shape index: {}]   ;;  %s1502_s3 = inlined_call_operand.vmem [shape: s32[8,8,8], index: 3, kind: input, shape index: {}]   ;;  %s1503_s4 = inlined_call_operand.hbm [shape: f32[8,8,8], index: 4, kind: input, shape index: {}]   ;;  %s1504_s5 = inlined_call_operand.hbm [shape: f32[8,8,32], index: 5, kind: output, shape index: {0}]   ;;  %s1505_s6 = inlined_call_operand.hbm [shape: f32[8,8,8], index: 6, kind: output, shape index: {1}]  }
   0x1   :  { %1516 = sst [smem:[#allocation21_spill]] %s1501_s2 }
   0x2   :  { %12 = vsyncpa [#allocation3], 0 }
   0x3   :  { %14 = vsyncpa [#allocation3 + $0x1], 0 }
   0x4   :  { %15 = vsyncpa [#allocation6], 0 }
   0x5   :  { %17 = vsyncpa [#allocation6 + $0x1], 0 }
   0x6   :  { %18 = vsyncpa [#allocation4], 0 }
   0x7   :  { %20 = vsyncpa [#allocation4 + $0x1], 0 }
   0x8   :  { %21 = vsyncpa [#allocation10], 0 }
   0x9   :  { %23 = vsyncpa [#allocation10 + $0x1], 0  ;;  %s1192_s21 = smov 0   ;;  %s1194_s22 = smov 0  }
   0xa   :  { %s1196_s23 = smov 0   ;;  %s1198_s24 = smov 0  }
   0xb   :  { %s1200_s25 = smov 0   ;;  %s1202_s26 = smov 0  }
   0xc LB: > { %1517 = sst [smem:[#allocation15_spill]] %s1128_s21  ;;  %s1223_s27 = sadd.s32 4294967295, %s1148_s26   ;;  %s1148_s26 = sphi %s1202_s26, %s29_s26   ;;  %s1144_s25 = sphi %s1200_s25, %s1544_s25   ;;  %s1140_s24 = sphi %s1198_s24, %s1543_s24   ;;  %s1136_s23 = sphi %s1196_s23, %s1547_s23   ;;  %s1132_s22 = sphi %s1194_s22, %s1546_s22   ;;  %s1128_s21 = sphi %s1192_s21, %s1545_s21  }
   0xd   : > { %1518 = sst [smem:[#allocation16_spill]] %s1144_s25  ;;  %s817_s28 = sadd.s32 4294967294, %s1148_s26  }
   0xe   : > { %1519 = sst [smem:[#allocation17_spill]] %s1148_s26  ;;  %s41_s29 = sadd.s32 1, %s1144_s25 }
   0xf   : > { %s76_s30 = sadd.s32 1, %s1136_s23  ;;  %p43_p0 = scmp.ge.s32.totalorder %s41_s29, 8 }
  0x10   : > { %p83_p1 = scmp.ne.s32.totalorder %s1136_s23, %s1132_s22  ;;  %p84_p2 = scmp.eq.s32.totalorder %s1148_s26, 0 }
  0x11   : > { %p89_p3 = scmp.ne.s32.totalorder %s1132_s22, %s1128_s21  ;;  %s1549_s29 = smov (%p43_p0, %s41_s29), 0 }
  0x12   : > { %1520 = sst [smem:[#allocation18_spill]] %s1549_s29  ;;  %p1235_p4 = por %p84_p2, %p83_p1 }
  0x13   : > { %p90_p5 = scmp.eq.s32.totalorder %s1223_s27, 0  ;;  %s73_s8 = ssub.s32 %s1144_s25, %s1549_s29 }
  0x14   : > { %p197_p6 = scmp.eq.s32.totalorder %s1223_s27, 7  ;;  %p74_p7 = scmp.eq.s32.totalorder %s73_s8, 0 }
  0x15   : > { %p1243_p8 = por %p90_p5, %p89_p3  ;;  %p203_p10 = scmp.eq.s32.totalorder %s817_s28, 7 }
  0x16   : > { %p1247_p9 = por %p197_p6, %p83_p1  ;;  %p884_p12 = scmp.lt.s32.totalorder %s1148_s26, 8 }
  0x17   : > { %s1522_s9 = scalar_select %p1243_p8, 1, 0 }
  0x18   : > { %s1523_s10 = scalar_select %p1247_p9, 1, 0 }
  0x19   : > { %s1252_s11 = scalar_select %p74_p7, %s1136_s23, %s76_s30  }
  0x1a   : > { %p1254_p11 = por %p203_p10, %p89_p3  ;;  %s1506_s13 = sand.u32 1, %s1136_s23  }
  0x1b   : > { %1524 = sst [smem:[#allocation19_spill]] %s1252_s11  ;;  %s1262_s14 = sshll.u32 %s1506_s13, 3 }
  0x1c   : > { %s1525_s12 = scalar_select %p1254_p11, 1, 0 }
  0x1d   : > { %s1265_s15 = sshll.u32 %s1144_s25, 7  ;;  %p1269_p13 = pnand %p884_p12, %p1235_p4 }
  0x1e   : > { %1526 = sst [smem:[#allocation20_spill]] %s1525_s12  ;;  %s279_s17 = sand.u32 1, %s1148_s26  }
  0x1f   : > { %s1527_s16 = scalar_select %p1269_p13, 1, 0 }
  0x20   : > { %s1528_s2 = sld [smem:[#allocation21_spill]]  ;;  %s283_s28 = scalar_lea.vmem [#allocation5], %s1262_s14 }
  0x21   : > { %s290_s30 = sshll.u32 %s283_s28, 4  ;;  %s1285_s7 = scalar_lea.sflag [#allocation6], %s279_s17  ;;  %s1282_s30 = int_to_ptr.vmem [resolvable:$true] %s290_s30 }
  0x22   : > { %p1291_p3 = pneg %p1269_p13 }
  0x26   : > { %s1278_s20 = scalar_lea.hbm %s1528_s2, %s1265_s15  ;;  %s945_s28 = scalar_lea.hbm %s1528_s2, 1024 }
  0x27   : > { %s940_s8 = scalar_lea.hbm %s1278_s20, 128  ;;  %p946_p6 = scmp.lt.u32.totalorder %s1278_s20, %s1528_s2 }
  0x28   : > { %p941_p2 = scmp.ne.s32.totalorder %s1278_s20, %s940_s8  ;;  %p947_p7 = scmp.lt.u32.totalorder %s945_s28, %s940_s8 }
  0x29   : > { %p949_p12 = scmp.lt.u32.totalorder %s940_s8, %s1278_s20 }
  0x2a   : > { %p943_p4 = pnand %p1291_p3, %p941_p2  ;;  %p948_p10 = por %p947_p7, %p946_p6 }
  0x2c   : > { %p944_p5 = pneg %p943_p4  ;;  %p950_p0 = por %p949_p12, %p948_p10 }
  0x2e   : > { %p951_p1 = pnand %p950_p0, %p944_p5 }
  0x30   : > { %954 = shalt.err (!%p951_p1)
}
  0x31   : > { %s955_s17 = scalar_lea.vmem %s1282_s30, 128  ;;  %s1150_s18 = smov [#allocation5]  }
  0x32   : > { %p956_p2 = scmp.ne.s32.totalorder %s1282_s30, %s955_s17  ;;  %s960_s19 = sshll.u32 %s1150_s18, 4  ;;  %s961_s19 = int_to_ptr.vmem [resolvable:$false] %s960_s19 }
  0x33   : > { %s962_s25 = scalar_lea.vmem %s961_s19, 256  ;;  %p963_p9 = scmp.lt.s32.totalorder %s1282_s30, %s961_s19 }
  0x34   : > { %p958_p4 = pnand %p956_p2, %p1291_p3  ;;  %p964_p8 = scmp.lt.s32.totalorder %s962_s25, %s955_s17 }
  0x36   : > { %p959_p11 = pneg %p958_p4  ;;  %p965_p6 = por %p964_p8, %p963_p9 }
  0x38   : > { %p966_p7 = pnand %p965_p6, %p959_p11 }
  0x3a   : > { %969 = shalt.err (!%p966_p7)
}
  0x3b   : > { %873 = dma.hbm_to_vmem [thread:$0]  (!%p1269_p13), %s1278_s20, 128, %s1282_s30, %s1285_s7  }
  0x3c   : > { %p1530_p0 = scmp.lt.s32.totalorder %s1148_s26, 9  ;;  %p1531_p1 = scmp.ge.s32.totalorder %s1148_s26, 1 }
  0x3d   : > { %s1327_s17 = scalar_lea.hbm %s1500_s1, %s1265_s15  ;;  %s265_s18 = scalar_lea.vmem [#allocation2], %s1262_s14 }
  0x3e   : > { %p1319_p5 = pnand %p1531_p1, %p1530_p0  ;;  %s272_s19 = sshll.u32 %s265_s18, 4  ;;  %s1330_s19 = int_to_ptr.vmem [resolvable:$true] %s272_s19 }
  0x3f   : > { %s1336_s25 = scalar_lea.hbm %s1503_s4, %s1265_s15  ;;  %s1533_s2 = sand.u32 1, %s1136_s23  }
  0x40   : > { %s1532_s29 = scalar_select %p1319_p5, 1, 0 }
  0x41   : > { %s262_s11 = scalar_lea.sflag [#allocation3], %s1533_s2  ;;  %s970_s12 = scalar_lea.hbm %s1327_s17, 128 }
  0x42   : > { %p971_p8 = scmp.ne.s32.totalorder %s1327_s17, %s970_s12  ;;  %s975_s21 = scalar_lea.hbm %s1500_s1, 1024 }
  0x43   : > { %p976_p10 = scmp.lt.u32.totalorder %s1327_s17, %s1500_s1  ;;  %p977_p12 = scmp.lt.u32.totalorder %s975_s21, %s970_s12 }
  0x44   : > { %p973_p9 = pnand %p971_p8, %p1291_p3  ;;  %p979_p4 = scmp.lt.u32.totalorder %s970_s12, %s1327_s17 }
  0x45   : > { %p978_p2 = por %p977_p12, %p976_p10 }
  0x46   : > { %p974_p11 = pneg %p973_p9 }
  0x47   : > { %p980_p6 = por %p979_p4, %p978_p2 }
  0x49   : > { %p981_p7 = pnand %p980_p6, %p974_p11 }
  0x4b   : > { %984 = shalt.err (!%p981_p7)
}
  0x4c   : > { %s985_s2 = scalar_lea.vmem %s1330_s19, 128  ;;  %s1151_s15 = smov [#allocation2]  }
  0x4d   : > { %p986_p0 = scmp.ne.s32.totalorder %s1330_s19, %s985_s2  ;;  %s990_s20 = sshll.u32 %s1151_s15, 4  ;;  %s991_s20 = int_to_ptr.vmem [resolvable:$false] %s990_s20 }
  0x4e   : > { %s992_s26 = scalar_lea.vmem %s991_s20, 256  ;;  %p993_p9 = scmp.lt.s32.totalorder %s1330_s19, %s991_s20 }
  0x4f   : > { %p988_p1 = pnand %p986_p0, %p1291_p3  ;;  %p994_p5 = scmp.lt.s32.totalorder %s992_s26, %s985_s2 }
  0x51   : > { %p989_p8 = pneg %p988_p1  ;;  %p995_p10 = por %p994_p5, %p993_p9 }
  0x53   : > { %p996_p12 = pnand %p995_p10, %p989_p8 }
  0x55   : > { %999 = shalt.err (!%p996_p12)
}
  0x56   : > { %870 = dma.hbm_to_vmem [thread:$0]  (!%p1269_p13), %s1327_s17, 128, %s1330_s19, %s262_s11  }
  0x57   : > { %s311_s21 = scalar_lea.vmem [#allocation7], %s1262_s14  ;;  %s1000_s30 = scalar_lea.hbm %s1336_s25, 128 }
  0x58   : > { %s319_s12 = sshll.u32 %s311_s21, 4  ;;  %p1001_p11 = scmp.ne.s32.totalorder %s1336_s25, %s1000_s30  ;;  %s320_s12 = int_to_ptr.vmem [resolvable:$true] %s319_s12 }
  0x59   : > { %s1005_s18 = scalar_lea.hbm %s1503_s4, 1024  ;;  %p1006_p4 = scmp.lt.u32.totalorder %s1336_s25, %s1503_s4 }
  0x5a   : > { %p1003_p5 = pnand %p1001_p11, %p1291_p3  ;;  %p1007_p6 = scmp.lt.u32.totalorder %s1005_s18, %s1000_s30 }
  0x5b   : > { %p1009_p0 = scmp.lt.u32.totalorder %s1000_s30, %s1336_s25 }
  0x5c   : > { %p1004_p2 = pneg %p1003_p5  ;;  %p1008_p7 = por %p1007_p6, %p1006_p4 }
  0x5e   : > { %p1010_p1 = por %p1009_p0, %p1008_p7 }
  0x60   : > { %p1011_p8 = pnand %p1010_p1, %p1004_p2 }
  0x62   : > { %1014 = shalt.err (!%p1011_p8)
}
  0x63   : > { %s1015_s11 = scalar_lea.vmem %s320_s12, 128  ;;  %s1152_s14 = smov [#allocation7]  }
  0x64   : > { %p1016_p9 = scmp.ne.s32.totalorder %s320_s12, %s1015_s11  ;;  %s1020_s17 = sshll.u32 %s1152_s14, 4  ;;  %s1021_s17 = int_to_ptr.vmem [resolvable:$false] %s1020_s17 }
  0x65   : > { %s1022_s19 = scalar_lea.vmem %s1021_s17, 256  ;;  %p1023_p11 = scmp.lt.s32.totalorder %s320_s12, %s1021_s17 }
  0x66   : > { %p1018_p10 = pnand %p1016_p9, %p1291_p3  ;;  %p1024_p5 = scmp.lt.s32.totalorder %s1022_s19, %s1015_s11 }
  0x68   : > { %p1019_p12 = pneg %p1018_p10  ;;  %p1025_p13 = por %p1024_p5, %p1023_p11 }
  0x6a   : > { %p1026_p4 = pnand %p1025_p13, %p1019_p12 }
  0x6c   : > { %1029 = shalt.err (!%p1026_p4)
}
  0x6d   : > { %p1534_p6 = scmp.ne.s32.totalorder %s1527_s16, 0  ;;  %p1535_p2 = scmp.ne.s32.totalorder %s1532_s29, 0 }
  0x6e   : > { %s1383_s13 = sand.u32 (!%p1535_p2), 1, %s1132_s22   ;;  %p1536_p13 = scmp.ne.s32.totalorder (!%p1535_p2), %s1522_s9, 0 }
  0x6f   : > { %876 = dma.hbm_to_vmem [thread:$0]  (!%p1534_p6), %s1336_s25, 128, %s320_s12, %s1285_s7  }
  0x70   : > { %328 = sbr.rel (%p1535_p2) target bundleno = 887 (0x377), region = 40  ;;  %s1386_s20 = sshll.u32 (!%p1535_p2), %s1383_s13, 3 }
  0x71   : > { %s331_s26 = scalar_lea.sflag (!%p1535_p2), [#allocation3], %s1383_s13  ;;  %s334_s21 = scalar_lea.vmem (!%p1535_p2), [#allocation2], %s1386_s20 }
  0x77   : > { %1111 = dma.done.wait (%p1536_p13), %s331_s26, 128  }
  0x78   : > { %1113 = vsyncadd (%p1536_p13), %s331_s26, 4294967168  ;;  %s339_s16 = sand.u32 1, %s1223_s27   ;;  %s343_s29 = scalar_lea.vmem [#allocation5], %s1386_s20 }
  0x79   : > { %s340_s7 = scalar_lea.sflag [#allocation6], %s339_s16 }
  0x7a   : > { %1115 = dma.done.wait (%p1536_p13), %s340_s7, 256  }
  0x7b   : > { %1117 = vsyncadd (%p1536_p13), %s340_s7, 4294967040  ;;  %p410_p3 = scmp.lt.s32.totalorder %s1140_s24, 7  ;;  %v1153_v0 = vmov 0.0   ;;  %vm1154_vm0 = vmmov 0   ;;  %vm429_vm1 = vcmask 261120   ;;  %v426_v1 = vld [vmem:[%s334_s21] sm:$0xff] }
  0x7c   : > { %847 = vmatprep.subr.mxu0 %v1153_v0  ;;  %849 = vmatprep.mubr.msk.f32.mxu0 %vm1154_vm0, %v1153_v0  ;;  %s352_s2 = scalar_lea.vmem [#allocation7], %s1386_s20  ;;  %vm509_vm3 = vcmask 64512   ;;  %v427_v16 = vld [vmem:[%s343_s29] sm:$0xff]  ;;  %s409_s15 = scalar_lea.vmem [#allocation9], %s1386_s20 }
  0x7d   : > { %s411_s25 = scalar_select %p410_p3, %s1140_s24, 7  ;;  %852 = vmatprep.subr.mxu1 %v1153_v0  ;;  %854 = vmatprep.mubr.msk.f32.mxu1 %vm1154_vm0, %v1153_v0  ;;  %v428_v5 = vld [vmem:[%s352_s2] sm:$0xff] }
  0x7e   : > { %848 = vmatpush3.xpose.msk.msra.mxu0 %vm429_vm1, %v426_v1  ;;  %853 = vmatpush3.msra.mxu1 %v427_v16  ;;  %s839_s11 = sshll.u32 %s1140_s24, 7  ;;  %s630_s26 = sshll.u32 %s409_s15, 4  ;;  %s631_s26 = int_to_ptr.vmem [resolvable:$true] %s630_s26 }
  0x7f   : > { %s832_s12 = sshll.u32 %s411_s25, 3  ;;  %s1424_s19 = scalar_lea.hbm %s1505_s6, %s839_s11 }
  0x80   : > { %s416_s8 = scalar_lea.vmem %s1499_s0, %s832_s12  ;;  %s423_s18 = scalar_lea.vmem %s1502_s3, %s832_s12 }
  0x81   : > { %v424_v2 = vld [vmem:[%s416_s8] sm:$0xff]  ;;  %s602_s21 = scalar_lea.sflag [#allocation10], %s1383_s13  ;;  %s1030_s16 = scalar_lea.vmem %s631_s26, 128 }
  0x82   : > { %v425_v3 = vmul.f32 0.17677669, %v424_v2  ;;  %v506_v4 = vld [vmem:[%s423_s18] sm:$0xff]  ;;  %p1031_p7 = scmp.ne.s32.totalorder %s631_s26, %s1030_s16  ;;  %p1537_p0 = scmp.ne.s32.totalorder %s1523_s10, 0 }
  0x83   : > { %vm507_vm2 = vcmp.ne.s32.totalorder %v506_v4, 0  ;;  %s1155_s7 = smov [#allocation9]  }
  0x84   : > { %850 = vmatmul.mubr.msk.f32.vlgmr.msra.gmra.mrb[0].mxu0 %vm429_vm1, %v425_v3  ;;  %p1032_p1 = pnand %p1031_p7, %p1537_p0  ;;  %s1034_s29 = sshll.u32 %s1155_s7, 4  ;;  %s1035_s29 = int_to_ptr.vmem [resolvable:$false] %s1034_s29 }
  0x85   : > { %s1036_s25 = scalar_lea.vmem %s1035_s29, 256  ;;  %p1037_p9 = scmp.lt.s32.totalorder %s631_s26, %s1035_s29 }
  0x86   : > { %p1033_p8 = pneg %p1032_p1  ;;  %p1038_p10 = scmp.lt.s32.totalorder %s1036_s25, %s1030_s16 }
  0x88   : > { %p1039_p12 = por %p1038_p10, %p1037_p9 }
  0x8a   : > { %p1040_p11 = pnand %p1039_p12, %p1033_p8 }
 0x157   : > { %v502_v6 = vpop.f32.mrb[0].mxu0 }
 0x158   : > { %v503_v7 = vadd.f32 %v502_v6, %v428_v5  ;;  %v851_v8 = vpop.f32.mrb[1].mxu0 }
 0x15a   : > { %v508_v9 = vsel %vm507_vm2, -1e+09, %v503_v7 }
 0x15b   : > { %v510_v10 = vsel %vm509_vm3, %v508_v9, -inf }
 0x15c   : > { %511 = vmax.xlane.f32.xlu0 %v510_v10 }
 0x1e9   : > { %v512_v11 = vpop.xlane.xlu0 %511 }
 0x1ea   : > { %v513_v12 = vsub.f32 %v508_v9, %v512_v11 }
 0x1ec   : > { %v514_v13 = vmul.f32 1.442695, %v513_v12 }
 0x1ee   : > { %936 = vpow2.f32 %v514_v13 }
 0x1f8   : > { %v937_v14 = vpop.eup %936 }
 0x1f9   : > { %v516_v15 = vsel %vm509_vm3, %v937_v14, 0.0 }
 0x1fa   : > { %517 = vadd.xlane.f32.xlu0 %v516_v15 }
 0x287   : > { %v518_v17 = vpop.xlane.xlu0 %517 }
 0x288   : > { %938 = vrcp.f32 %v518_v17 }
 0x292   : > { %v939_v18 = vpop.eup %938 }
 0x293   : > { %v520_v19 = vmul.f32 %v939_v18, %v937_v14 }
 0x295   : > { %855 = vmatmul.mubr.msk.f32.vlgmr.msra.gmra.mrb[0].mxu1 %vm509_vm3, %v520_v19  ;;  %595 = vst.msk [vmem:[%s409_s15] sm:$0xff] %vm509_vm3, %v520_v19 }
 0x296   : > { %1043 = shalt.err (!%p1040_p11)
}
 0x297   : > { %s1044_s12 = scalar_lea.hbm %s1424_s19, 128  ;;  %s1048_s8 = scalar_lea.hbm %s1505_s6, 1024 }
 0x298   : > { %p1045_p5 = scmp.ne.s32.totalorder %s1424_s19, %s1044_s12  ;;  %p1049_p2 = scmp.lt.u32.totalorder %s1424_s19, %s1505_s6 }
 0x299   : > { %p1050_p13 = scmp.lt.u32.totalorder %s1048_s8, %s1044_s12  ;;  %p1052_p7 = scmp.lt.u32.totalorder %s1044_s12, %s1424_s19 }
 0x29a   : > { %p1046_p4 = pnand %p1045_p5, %p1537_p0 }
 0x29b   : > { %p1051_p3 = por %p1050_p13, %p1049_p2 }
 0x29c   : > { %p1047_p6 = pneg %p1046_p4 }
 0x29d   : > { %p1053_p1 = por %p1052_p7, %p1051_p3 }
 0x29f   : > { %p1054_p8 = pnand %p1053_p1, %p1047_p6 }
 0x2a1   : > { %1057 = shalt.err (!%p1054_p8)
}
 0x2a2   : > { %864 = dma.vmem_to_hbm [thread:$0]  (%p1537_p0), %s631_s26, 128, %s1424_s19, %s602_s21  }
 0x2a3   : > { %s402_s18 = scalar_lea.vmem [#allocation8], %s1386_s20  ;;  %s1450_s17 = scalar_lea.hbm %s1504_s5, %s839_s11 }
 0x2a4   : > { %s616_s2 = sshll.u32 %s402_s18, 4  ;;  %s597_s16 = scalar_lea.sflag [#allocation4], %s1383_s13  ;;  %s1452_s2 = int_to_ptr.vmem [resolvable:$true] %s616_s2 }
 0x2a5   : > { %s1058_s7 = scalar_lea.vmem %s1452_s2, 128  ;;  %s1156_s24 = smov [#allocation8]  }
 0x2a6   : > { %p1059_p9 = scmp.ne.s32.totalorder %s1452_s2, %s1058_s7  ;;  %s1062_s20 = sshll.u32 %s1156_s24, 4  ;;  %s1063_s20 = int_to_ptr.vmem [resolvable:$false] %s1062_s20 }
 0x2a7   : > { %s1064_s11 = scalar_lea.vmem %s1063_s20, 256  ;;  %p1065_p11 = scmp.lt.s32.totalorder %s1452_s2, %s1063_s20 }
 0x2a8   : > { %p1060_p10 = pnand %p1059_p9, %p1537_p0  ;;  %p1066_p5 = scmp.lt.s32.totalorder %s1064_s11, %s1058_s7 }
 0x2aa   : > { %p1061_p12 = pneg %p1060_p10  ;;  %p1067_p4 = por %p1066_p5, %p1065_p11 }
 0x2ac   : > { %p1068_p6 = pnand %p1067_p4, %p1061_p12 }
 0x368   : > { %v590_v20 = vpop.f32.mrb[0].mxu1 }
 0x369   : > { %594 = vst.msk [vmem:[%s402_s18] sm:$0xff] %vm429_vm1, %v590_v20  ;;  %v856_v21 = vpop.f32.mrb[1].mxu1 }
 0x36a   : > { %1071 = shalt.err (!%p1068_p6)
}
 0x36b   : > { %s1072_s13 = scalar_lea.hbm %s1450_s17, 128  ;;  %s1076_s21 = scalar_lea.hbm %s1504_s5, 1024 }
 0x36c   : > { %p1073_p2 = scmp.ne.s32.totalorder %s1450_s17, %s1072_s13  ;;  %p1077_p7 = scmp.lt.u32.totalorder %s1450_s17, %s1504_s5 }
 0x36d   : > { %p1078_p1 = scmp.lt.u32.totalorder %s1076_s21, %s1072_s13  ;;  %p1080_p9 = scmp.lt.u32.totalorder %s1072_s13, %s1450_s17 }
 0x36e   : > { %p1074_p13 = pnand %p1073_p2, %p1537_p0 }
 0x36f   : > { %p1079_p8 = por %p1078_p1, %p1077_p7 }
 0x370   : > { %p1075_p3 = pneg %p1074_p13 }
 0x371   : > { %p1081_p10 = por %p1080_p9, %p1079_p8 }
 0x373   : > { %p1082_p12 = pnand %p1081_p10, %p1075_p3 }
 0x375   : > { %1085 = shalt.err (!%p1082_p12)
}
 0x376   : > { %863 = dma.vmem_to_hbm [thread:$0]  (%p1537_p0), %s1452_s2, 128, %s1450_s17, %s597_s16  }
 0x377 PF: > { %s1538_s12 = sld [smem:[#allocation17_spill]]  ;;  %s1539_s27 = sld [smem:[#allocation15_spill]] }
 0x378   : > { %s1540_s30 = sld [smem:[#allocation20_spill]] }
 0x37d   : > { %p885_p11 = scmp.ge.s32.totalorder %s1538_s12, 2  ;;  %s642_s8 = sand.u32 1, %s1539_s27  }
 0x37e   : > { %p1541_p5 = scmp.ne.s32.totalorder %s1540_s30, 0  ;;  %s643_s9 = scalar_lea.sflag [#allocation4], %s642_s8 }
 0x380   : > { %p878_p4 = pnand %p885_p11, %p1541_p5 }
 0x382   : > { %1119 = dma.done.wait (!%p878_p4), %s643_s9, 128  }
 0x383   : > { %1121 = vsyncadd (!%p878_p4), %s643_s9, 4294967168  ;;  %s652_s28 = scalar_lea.sflag [#allocation10], %s642_s8 }
 0x384   : > { %1123 = dma.done.wait (!%p878_p4), %s652_s28, 128  }
 0x385   : > { %1125 = vsyncadd (!%p878_p4), %s652_s28, 4294967168  ;;  %s29_s26 = sadd.s32 1, %s1538_s12   ;;  %s1542_s10 = sld [smem:[#allocation19_spill]] }
 0x386   : > { %p26_p6 = scmp.ge.s32.totalorder %s29_s26, 10   ;;  %s1543_s24 = sld [smem:[#allocation16_spill]] }
 0x387   : > { %s1544_s25 = sld [smem:[#allocation18_spill]]  ;;  %s1545_s21 = smov %s1132_s22 }
 0x388   : > { %s1546_s22 = smov %s1136_s23  ;;  %28 = sbr.rel (!%p26_p6) target bundleno = 12 (0xc), region = 132 }
 0x38b   : > { %s1547_s23 = smov %s1542_s10 }
 0x38f   :  { %657 = vsyncpa [#allocation3], 1 }
 0x390   :  { %659 = vsyncpa [#allocation3 + $0x1], 1 }
 0x391   :  { %660 = vsyncpa [#allocation6], 1 }
 0x392   :  { %662 = vsyncpa [#allocation6 + $0x1], 1 }
 0x393   :  { %663 = vsyncpa [#allocation4], 1 }
 0x394   :  { %665 = vsyncpa [#allocation4 + $0x1], 1 }
 0x395   :  { %666 = vsyncpa [#allocation10], 1 }
 0x396   :  { %668 = vsyncpa [#allocation10 + $0x1], 1 }

</bundles_post_ra>
